<compile_context>
chip_gen: v6e
topology: v6e:2x2x1
jax: 0.10.0
libtpu: 0.0.40
codegen_flags: <defaults>
</compile_context>

<pallas_src>
import functools

import jax
import jax.numpy as jnp
from jax.experimental import pallas as pl
from jax.experimental.pallas import tpu as pltpu


def _round_up(x, m):
    return ((x + m - 1) // m) * m


def actor_kernel(x_ref, wf1_ref, bf1_ref, wf2_ref, bf2_ref, wf3_ref, b3_ref, o_ref,
                 *, n_latent):
    x = x_ref[...]                                   # (TB, S), already matmul dtype
    tb, nf = x.shape[0], wf1_ref.shape[1]

    # Lane mask: lanes [0, H) carry the hidden path (tanh), lanes [H, H+A) carry the
    # linear skip contribution x[:, 60:120] @ W3[H:].
    lane = jax.lax.broadcasted_iota(jnp.int32, (tb, nf), 1)
    is_hidden = lane < n_latent

    # Layer 1 fused with the skip matmul (single MXU pass, N = H + A <= 128).
    z1 = jnp.dot(x, wf1_ref[...], preferred_element_type=jnp.float32) + bf1_ref[...]
    a1 = jnp.where(is_hidden, jnp.tanh(z1), z1)      # [h1 | skip], f32

    # Layer 2; skip lanes pass through the identity block of Wf2 untouched.
    z2 = (jnp.dot(a1.astype(wf2_ref.dtype), wf2_ref[...],
                  preferred_element_type=jnp.float32) + bf2_ref[...])
    a2 = jnp.where(is_hidden, jnp.tanh(z2), z2)      # [out1 | skip], f32

    # Layer 3: logits = out1 @ W3[:H] + skip + b3  (skip enters via identity rows).
    logits = (jnp.dot(a2.astype(wf3_ref.dtype), wf3_ref[...],
                      preferred_element_type=jnp.float32) + b3_ref[...])

    # Stable softmax with an EXACT divide so rows sum to 1 (previous approx
    # reciprocal broke the normalization check).
    m = jnp.max(logits, axis=-1, keepdims=True)
    e = jnp.exp(logits - m)
    s = jnp.sum(e, axis=-1, keepdims=True)
    o_ref[...] = (e / s).astype(o_ref.dtype)


def actor_forward(x, params, *, tile_b=2048, matmul_dtype=jnp.bfloat16):
    """x: (B, state_dim) or (state_dim,) float32. Returns softmax probs over actions."""
    w1, b1, w2, b2, w3, b3 = params
    state_dim, n_latent = w1.shape
    action_dim = w3.shape[1]
    nf = n_latent + action_dim
    assert x.shape[-1] == state_dim and state_dim >= 120
    assert w3.shape[0] == n_latent + 60, "W3 must have n_latent + 60 input rows"

    squeeze = x.ndim == 1
    if squeeze:                      # mirror the PyTorch 1-D branch via a batch of 1
        x = x[None, :]
    B = x.shape[0]

    f32 = jnp.float32

    # --- Fused weights (host-side prep, all tiny) -------------------------------
    # Skip weight padded to full state_dim rows: rows 60..119 hold W3[H:].
    w3b_pad = jnp.zeros((state_dim, action_dim), f32).at[60:120, :].set(
        w3[n_latent:, :].astype(f32))

    # Layer 1: [W1 | W3b_pad]  (S, H+A)
    wf1 = jnp.concatenate([w1.astype(f32), w3b_pad], axis=1)
    bf1 = jnp.concatenate([b1.astype(f32), jnp.zeros((action_dim,), f32)]).reshape(1, nf)

    # Layer 2: blockdiag(W2, I_A)  (H+A, H+A) — identity carries the skip lanes.
    wf2 = (jnp.zeros((nf, nf), f32)
           .at[:n_latent, :n_latent].set(w2.astype(f32))
           .at[n_latent:, n_latent:].set(jnp.eye(action_dim, dtype=f32)))
    bf2 = jnp.concatenate([b2.astype(f32), jnp.zeros((action_dim,), f32)]).reshape(1, nf)

    # Layer 3: [W3[:H] ; I_A]  (H+A, A) — identity rows add the skip contribution.
    wf3 = jnp.concatenate([w3[:n_latent, :].astype(f32),
                           jnp.eye(action_dim, dtype=f32)], axis=0)
    b3r = b3.reshape(1, -1).astype(f32)

    # Matmul-operand dtype (bf16 default: MXU-native on v6e/v7x, halves operand
    # VMEM/vreg and the streamed-x DMA). Biases stay f32; accumulation is f32.
    wf1m = wf1.astype(matmul_dtype)
    wf2m = wf2.astype(matmul_dtype)
    wf3m = wf3.astype(matmul_dtype)
    x = x.astype(matmul_dtype)        # cast BEFORE the kernel so HBM traffic shrinks

    # --- Batch tiling ------------------------------------------------------------
    # TB: multiple of 8, capped at tile_b, and capped at ~B/2 so large batches give
    # >=2 grid steps (both v7x TensorCores busy under "parallel").
    TB = int(min(tile_b, max(8, _round_up(-(-B // 2), 8))))
    Bp = _round_up(B, TB)
    if Bp != B:
        x = jnp.pad(x, ((0, Bp - B), (0, 0)))
    grid = (Bp // TB,)

    x_spec = pl.BlockSpec((TB, state_dim), lambda i: (i, 0))
    o_spec = pl.BlockSpec((TB, action_dim), lambda i: (i, 0))

    def const(shape):
        # Weights/biases: same block every grid step -> stay resident in VMEM.
        return pl.BlockSpec(shape, lambda i: (0, 0))

    out = pl.pallas_call(
        functools.partial(actor_kernel, n_latent=n_latent),
        out_shape=jax.ShapeDtypeStruct((Bp, action_dim), jnp.float32),
        grid=grid,
        in_specs=[
            x_spec,
            const((state_dim, nf)),
            const((1, nf)),
            const((nf, nf)),
            const((1, nf)),
            const((nf, action_dim)),
            const((1, action_dim)),
        ],
        out_specs=o_spec,
        compiler_params=pltpu.CompilerParams(
            dimension_semantics=("parallel",),
        ),
    )(x, wf1m, bf1, wf2m, bf2, wf3m, b3r)

    out = out[:B]
    return out[0] if squeeze else out


def init_params(key, state_dim, n_latent_var, action_dim):
    """Deterministic synthetic init (uniform, roughly like nn.Linear's default scale).
    Weights are stored as (in_features, out_features), i.e. transposed vs nn.Linear."""
    ks = jax.random.split(key, 6)

    def u(k, shape, fan_in):
        bound = 1.0 / jnp.sqrt(fan_in)
        return jax.random.uniform(k, shape, jnp.float32, -bound, bound)

    w1 = u(ks[0], (state_dim, n_latent_var), state_dim)
    b1 = u(ks[1], (n_latent_var,), state_dim)
    w2 = u(ks[2], (n_latent_var, n_latent_var), n_latent_var)
    b2 = u(ks[3], (n_latent_var,), n_latent_var)
    w3 = u(ks[4], (n_latent_var + 60, action_dim), n_latent_var + 60)
    b3 = u(ks[5], (action_dim,), n_latent_var + 60)
    return w1, b1, w2, b2, w3, b3


def _reference(x, params):
    w1, b1, w2, b2, w3, b3 = params
    h = jnp.tanh(x @ w1 + b1)
    out1 = jnp.tanh(h @ w2 + b2)
    cat = jnp.concatenate([out1, x[:, 60:120]], axis=1)
    return jax.nn.softmax(cat @ w3 + b3, axis=-1)


if __name__ == "__main__":
    state_dim, n_latent_var, action_dim = 128, 64, 16
    batch = 8

    key = jax.random.PRNGKey(0)
    kx, kp = jax.random.split(key)
    x = jax.random.normal(kx, (batch, state_dim), jnp.float32)
    params = init_params(kp, state_dim, n_latent_var, action_dim)

    ref = _reference(x, params)

    # f32 matmul-operand path: tight check (exact softmax normalization).
    probs = actor_forward(x, params, matmul_dtype=jnp.float32)
    jax.block_until_ready(probs)
    assert probs.shape == (batch, action_dim)
    assert jnp.allclose(probs, ref, atol=2e-3, rtol=2e-3), "f32 mismatch vs reference"
    assert jnp.allclose(jnp.sum(probs, axis=-1), 1.0, atol=1e-4), "rows must sum to 1"

    # Default (bf16 matmul-operand) path: loose per-element check, exact normalization.
    probs_bf16 = actor_forward(x, params)
    jax.block_until_ready(probs_bf16)
    assert jnp.all(jnp.isfinite(probs_bf16))
    assert jnp.allclose(probs_bf16, ref, atol=5e-2), "bf16 path deviates too far"
    assert jnp.allclose(jnp.sum(probs_bf16, axis=-1), 1.0, atol=1e-4)

    # 1-D input branch (mirrors the PyTorch len(input.shape)==1 path).
    probs_1d = actor_forward(x[0], params, matmul_dtype=jnp.float32)
    jax.block_until_ready(probs_1d)
    assert probs_1d.shape == (action_dim,)
    assert jnp.allclose(probs_1d, ref[0], atol=2e-3, rtol=2e-3)

    print("KERNEL_OK")
</pallas_src>

<mosaic_0001>
module attributes {stable_mosaic.version = 11 : i64} {
  func.func @actor_kernel(%arg0: i32, %arg1: memref<8x128xf32, #tpu.memory_space<vmem>>, %arg2: memref<128x80xf32, #tpu.memory_space<vmem>>, %arg3: memref<1x80xf32, #tpu.memory_space<vmem>>, %arg4: memref<80x80xf32, #tpu.memory_space<vmem>>, %arg5: memref<1x80xf32, #tpu.memory_space<vmem>>, %arg6: memref<80x16xf32, #tpu.memory_space<vmem>>, %arg7: memref<1x16xf32, #tpu.memory_space<vmem>>, %arg8: memref<8x16xf32, #tpu.memory_space<vmem>>) attributes {dimension_semantics = [#tpu.dimension_semantics<parallel>], iteration_bounds = array<i64: 1>, scalar_prefetch = 0 : i64, scratch_operands = 0 : i64, tpu.core_type = #tpu.core_type<tc>, window_params = [{transform_indices = @transform_0, window_bounds = array<i64: 8, 128>}, {pipeline_mode = #tpu.pipeline_mode<synchronous>, transform_indices = @transform_1, window_bounds = array<i64: 128, 80>}, {pipeline_mode = #tpu.pipeline_mode<synchronous>, transform_indices = @transform_2, window_bounds = array<i64: 1, 80>}, {pipeline_mode = #tpu.pipeline_mode<synchronous>, transform_indices = @transform_3, window_bounds = array<i64: 80, 80>}, {pipeline_mode = #tpu.pipeline_mode<synchronous>, transform_indices = @transform_4, window_bounds = array<i64: 1, 80>}, {pipeline_mode = #tpu.pipeline_mode<synchronous>, transform_indices = @transform_5, window_bounds = array<i64: 80, 16>}, {pipeline_mode = #tpu.pipeline_mode<synchronous>, transform_indices = @transform_6, window_bounds = array<i64: 1, 16>}, {transform_indices = @transform_7, window_bounds = array<i64: 8, 16>}]} {
    %c0 = arith.constant 0 : index
    %c0_0 = arith.constant 0 : index
    %0 = vector.load %arg1[%c0, %c0_0] : memref<8x128xf32, #tpu.memory_space<vmem>>, vector<8x128xf32>
    %1 = tpu.iota {dimensions = array<i32: 1>} : vector<8x80xi32>
    %c64_i32 = arith.constant 64 : i32
    %2 = vector.broadcast %c64_i32 : i32 to vector<8x80xi32>
    %3 = arith.cmpi slt, %1, %2 : vector<8x80xi32>
    %c0_1 = arith.constant 0 : index
    %c0_2 = arith.constant 0 : index
    %4 = vector.load %arg2[%c0_1, %c0_2] : memref<128x80xf32, #tpu.memory_space<vmem>>, vector<128x80xf32>
    %cst = arith.constant dense<0.000000e+00> : vector<8x80xf32>
    %5 = tpu.matmul %0, %4, %cst {dimension_numbers = #tpu.dot_dimension_numbers<[1], [0], [0], [1], [0, 0, 1, 1], [], []>} : vector<8x128xf32>, vector<128x80xf32>, vector<8x80xf32> -> vector<8x80xf32>
    %c0_3 = arith.constant 0 : index
    %c0_4 = arith.constant 0 : index
    %6 = vector.load %arg3[%c0_3, %c0_4] : memref<1x80xf32, #tpu.memory_space<vmem>>, vector<1x80xf32>
    %7 = vector.broadcast %6 : vector<1x80xf32> to vector<8x80xf32>
    %8 = arith.addf %5, %7 : vector<8x80xf32>
    %9 = math.tanh %8 : vector<8x80xf32>
    %10 = arith.select %3, %9, %8 : vector<8x80xi1>, vector<8x80xf32>
    %c0_5 = arith.constant 0 : index
    %c0_6 = arith.constant 0 : index
    %11 = vector.load %arg4[%c0_5, %c0_6] : memref<80x80xf32, #tpu.memory_space<vmem>>, vector<80x80xf32>
    %cst_7 = arith.constant dense<0.000000e+00> : vector<8x80xf32>
    %12 = tpu.matmul %10, %11, %cst_7 {dimension_numbers = #tpu.dot_dimension_numbers<[1], [0], [0], [1], [0, 0, 1, 1], [], []>} : vector<8x80xf32>, vector<80x80xf32>, vector<8x80xf32> -> vector<8x80xf32>
    %c0_8 = arith.constant 0 : index
    %c0_9 = arith.constant 0 : index
    %13 = vector.load %arg5[%c0_8, %c0_9] : memref<1x80xf32, #tpu.memory_space<vmem>>, vector<1x80xf32>
    %14 = vector.broadcast %13 : vector<1x80xf32> to vector<8x80xf32>
    %15 = arith.addf %12, %14 : vector<8x80xf32>
    %16 = math.tanh %15 : vector<8x80xf32>
    %17 = arith.select %3, %16, %15 : vector<8x80xi1>, vector<8x80xf32>
    %c0_10 = arith.constant 0 : index
    %c0_11 = arith.constant 0 : index
    %18 = vector.load %arg6[%c0_10, %c0_11] : memref<80x16xf32, #tpu.memory_space<vmem>>, vector<80x16xf32>
    %cst_12 = arith.constant dense<0.000000e+00> : vector<8x16xf32>
    %19 = tpu.matmul %17, %18, %cst_12 {dimension_numbers = #tpu.dot_dimension_numbers<[1], [0], [0], [1], [0, 0, 1, 1], [], []>} : vector<8x80xf32>, vector<80x16xf32>, vector<8x16xf32> -> vector<8x16xf32>
    %c0_13 = arith.constant 0 : index
    %c0_14 = arith.constant 0 : index
    %20 = vector.load %arg7[%c0_13, %c0_14] : memref<1x16xf32, #tpu.memory_space<vmem>>, vector<1x16xf32>
    %21 = vector.broadcast %20 : vector<1x16xf32> to vector<8x16xf32>
    %22 = arith.addf %19, %21 : vector<8x16xf32>
    %cst_15 = arith.constant dense<0xFF800000> : vector<8xf32>
    %23 = vector.multi_reduction <maximumf>, %22, %cst_15 [1] : vector<8x16xf32> to vector<8xf32>
    %24 = vector.shape_cast %23 : vector<8xf32> to vector<8x1xf32>
    %25 = vector.broadcast %24 : vector<8x1xf32> to vector<8x16xf32>
    %26 = arith.subf %22, %25 : vector<8x16xf32>
    %27 = math.exp %26 : vector<8x16xf32>
    %cst_16 = arith.constant dense<0.000000e+00> : vector<8xf32>
    %28 = vector.multi_reduction <add>, %27, %cst_16 [1] : vector<8x16xf32> to vector<8xf32>
    %29 = vector.shape_cast %28 : vector<8xf32> to vector<8x1xf32>
    %30 = vector.broadcast %29 : vector<8x1xf32> to vector<8x16xf32>
    %31 = arith.divf %27, %30 : vector<8x16xf32>
    %c0_17 = arith.constant 0 : index
    %c0_18 = arith.constant 0 : index
    %32 = vector.load %arg8[%c0_17, %c0_18] : memref<8x16xf32, #tpu.memory_space<vmem>>, vector<8x16xf32>
    tpu.vector_store %arg8[%c0_17, %c0_18], %31 {strides = array<i32>} : memref<8x16xf32, #tpu.memory_space<vmem>>, vector<8x16xf32>,
    return
  }
  func.func @transform_0(%arg0: i32) -> (i32, i32) {
    %c0_i32 = arith.constant 0 : i32
    %c0_i32_0 = arith.constant 0 : i32
    return %arg0, %c0_i32 : i32, i32
  }
  func.func @transform_1(%arg0: i32) -> (i32, i32) {
    %c0_i32 = arith.constant 0 : i32
    %c0_i32_0 = arith.constant 0 : i32
    %c0_i32_1 = arith.constant 0 : i32
    return %c0_i32, %c0_i32_0 : i32, i32
  }
  func.func @transform_2(%arg0: i32) -> (i32, i32) {
    %c0_i32 = arith.constant 0 : i32
    %c0_i32_0 = arith.constant 0 : i32
    %c0_i32_1 = arith.constant 0 : i32
    return %c0_i32, %c0_i32_0 : i32, i32
  }
  func.func @transform_3(%arg0: i32) -> (i32, i32) {
    %c0_i32 = arith.constant 0 : i32
    %c0_i32_0 = arith.constant 0 : i32
    %c0_i32_1 = arith.constant 0 : i32
    return %c0_i32, %c0_i32_0 : i32, i32
  }
  func.func @transform_4(%arg0: i32) -> (i32, i32) {
    %c0_i32 = arith.constant 0 : i32
    %c0_i32_0 = arith.constant 0 : i32
    %c0_i32_1 = arith.constant 0 : i32
    return %c0_i32, %c0_i32_0 : i32, i32
  }
  func.func @transform_5(%arg0: i32) -> (i32, i32) {
    %c0_i32 = arith.constant 0 : i32
    %c0_i32_0 = arith.constant 0 : i32
    %c0_i32_1 = arith.constant 0 : i32
    return %c0_i32, %c0_i32_0 : i32, i32
  }
  func.func @transform_6(%arg0: i32) -> (i32, i32) {
    %c0_i32 = arith.constant 0 : i32
    %c0_i32_0 = arith.constant 0 : i32
    %c0_i32_1 = arith.constant 0 : i32
    return %c0_i32, %c0_i32_0 : i32, i32
  }
  func.func @transform_7(%arg0: i32) -> (i32, i32) {
    %c0_i32 = arith.constant 0 : i32
    %c0_i32_0 = arith.constant 0 : i32
    return %arg0, %c0_i32 : i32, i32
  }
}

</mosaic_0001>

<bundles_post_ra>
// kernel: tpu_custom_call.1
= control target key start
LH: loop header
LB: loop body
LE: loop exit
PB: predicated region body
PF: predicated region fallthrough
CT: control target
= control target key end

     0   :  { %v494_v1 = vmov 0.0   ;;  %vm495_vm0 = vmmov 0   ;;  %s709_s0 = inlined_call_operand.vmem [shape: f32[8,128], index: 0, kind: input, shape index: {}]   ;;  %s710_s1 = inlined_call_operand.vmem [shape: f32[128,80], index: 1, kind: input, shape index: {}]   ;;  %s711_s2 = inlined_call_operand.vmem [shape: f32[1,80], index: 2, kind: input, shape index: {}]   ;;  %s712_s3 = inlined_call_operand.vmem [shape: f32[80,80], index: 3, kind: input, shape index: {}]   ;;  %s713_s4 = inlined_call_operand.vmem [shape: f32[1,80], index: 4, kind: input, shape index: {}]   ;;  %s714_s5 = inlined_call_operand.vmem [shape: f32[80,16], index: 5, kind: input, shape index: {}]   ;;  %s715_s6 = inlined_call_operand.vmem [shape: f32[1,16], index: 6, kind: input, shape index: {}]   ;;  %s716_s7 = inlined_call_operand.hbm [shape: f32[8,16], index: 7, kind: output, shape index: {}]  }
   0x1   :  { %v46_v0 = vld [vmem:[%s710_s1 + $0x78] sm:$0xff]  ;;  %380 = vmatprep.subr.mxu0 %v494_v1  ;;  %v45_v2 = vld [vmem:[%s710_s1 + $0x70] sm:$0xff]  ;;  %412 = vmatprep.mubr.msk.f32.mxu0 %vm495_vm0, %v494_v1  ;;  %v44_v3 = vld [vmem:[%s710_s1 + $0x68] sm:$0xff] }
   0x2   :  { %381 = vmatpush3.msra.mxu0 %v46_v0  ;;  %415 = vmatprep.subr.mxu1 %v494_v1  ;;  %v43_v4 = vld [vmem:[%s710_s1 + $0x60] sm:$0xff]  ;;  %v135_v5 = vld [vmem:[%s712_s3 + $0x48] sm:$0xff] }
   0x3   :  { %382 = vmatprep.subr.mxu0 %v494_v1  ;;  %435 = vmatprep.mubr.msk.f32.mxu1 %vm495_vm0, %v494_v1 }
   0x4   :  { %383 = vmatpush3.msra.mxu0 %v45_v2  ;;  %416 = vmatpush3.msra.mxu1 %v135_v5 }
   0x5   :  { %384 = vmatprep.subr.mxu0 %v494_v1 }
   0x6   :  { %385 = vmatpush3.msra.mxu0 %v44_v3 }
   0x7   :  { %12 = vsyncpa [#allocation3], 0  ;;  %386 = vmatprep.subr.mxu0 %v494_v1  ;;  %v42_v6 = vld [vmem:[%s710_s1 + $0x58] sm:$0xff]  ;;  %417 = vmatprep.subr.mxu1 %v494_v1  ;;  %v41_v7 = vld [vmem:[%s710_s1 + $0x50] sm:$0xff]  ;;  %v28_v32 = vlaneseq  ;;  %vm143_vm2 = vcmask 654336   ;;  %vm309_vm3 = vcmask 130048  }
   0x8   :  { %387 = vmatpush3.msra.mxu0 %v43_v4  ;;  %v40_v8 = vld [vmem:[%s710_s1 + $0x48] sm:$0xff]  ;;  %v39_v9 = vld [vmem:[%s710_s1 + $0x40] sm:$0xff]  ;;  %v38_v10 = vld [vmem:[%s710_s1 + $0x38] sm:$0xff] }
   0x9   :  { %388 = vmatprep.subr.mxu0 %v494_v1  ;;  %v37_v11 = vld [vmem:[%s710_s1 + $0x30] sm:$0xff]  ;;  %v36_v12 = vld [vmem:[%s710_s1 + $0x28] sm:$0xff]  ;;  %v35_v13 = vld [vmem:[%s710_s1 + $0x20] sm:$0xff]  ;;  %v29_v33 = vand.u32 127, %v28_v32 }
   0xa   :  { %389 = vmatpush3.msra.mxu0 %v42_v6  ;;  %v34_v14 = vld [vmem:[%s710_s1 + $0x18] sm:$0xff]  ;;  %v33_v15 = vld [vmem:[%s710_s1 + $0x10] sm:$0xff]  ;;  %v32_v16 = vld [vmem:[%s710_s1 + $0x8] sm:$0xff] }
   0xb   :  { %390 = vmatprep.subr.mxu0 %v494_v1  ;;  %v31_v17 = vld [vmem:[%s710_s1] sm:$0xff]  ;;  %v133_v20 = vld [vmem:[%s712_s3 + $0x38] sm:$0xff]  ;;  %v132_v21 = vld [vmem:[%s712_s3 + $0x30] sm:$0xff]  ;;  %vm30_vm1 = vcmp.lt.s32.totalorder %v29_v33, 64 }
   0xc   :  { %391 = vmatpush3.msra.mxu0 %v41_v7  ;;  %v27_v18 = vld [vmem:[%s709_s0] sm:$0xff]  ;;  %v131_v22 = vld [vmem:[%s712_s3 + $0x28] sm:$0xff]  ;;  %v129_v24 = vld [vmem:[%s712_s3 + $0x18] sm:$0xff] }
   0xd   :  { %392 = vmatprep.subr.mxu0 %v494_v1  ;;  %v134_v19 = vld [vmem:[%s712_s3 + $0x40] sm:$0xff]  ;;  %v128_v25 = vld [vmem:[%s712_s3 + $0x10] sm:$0xff]  ;;  %v127_v26 = vld [vmem:[%s712_s3 + $0x8] sm:$0xff] }
   0xe   :  { %393 = vmatpush3.msra.mxu0 %v40_v8  ;;  %418 = vmatpush3.msra.mxu1 %v134_v19  ;;  %v130_v23 = vld [vmem:[%s712_s3 + $0x20] sm:$0xff]  ;;  %v228_v35 = vld [vmem:[%s714_s5 + $0x48] sm:$0xff]  ;;  %v226_v38 = vld [vmem:[%s714_s5 + $0x38] sm:$0xff] }
   0xf   :  { %394 = vmatprep.subr.mxu0 %v494_v1  ;;  %419 = vmatprep.subr.mxu1 %v494_v1  ;;  %v126_v27 = vld [vmem:[%s712_s3] sm:$0xff]  ;;  %v225_v39 = vld [vmem:[%s714_s5 + $0x30] sm:$0xff]  ;;  %v224_v40 = vld [vmem:[%s714_s5 + $0x28] sm:$0xff] }
  0x10   :  { %395 = vmatpush3.msra.mxu0 %v39_v9  ;;  %420 = vmatpush3.msra.mxu1 %v133_v20  ;;  %v336_v28 = vld [vmem:[%s711_s2] ss:$0 sm:$0xff]  ;;  %v222_v42 = vld [vmem:[%s714_s5 + $0x18] sm:$0xff]  ;;  %v221_v43 = vld [vmem:[%s714_s5 + $0x10] sm:$0xff] }
  0x11   :  { %396 = vmatprep.subr.mxu0 %v494_v1  ;;  %421 = vmatprep.subr.mxu1 %v494_v1  ;;  %v227_v37 = vld [vmem:[%s714_s5 + $0x40] sm:$0xff]  ;;  %v220_v44 = vld [vmem:[%s714_s5 + $0x8] sm:$0xff] }
  0x12   :  { %397 = vmatpush3.msra.mxu0 %v38_v10  ;;  %422 = vmatpush3.msra.mxu1 %v132_v21  ;;  %v223_v41 = vld [vmem:[%s714_s5 + $0x20] sm:$0xff] }
  0x13   :  { %398 = vmatprep.subr.mxu0 %v494_v1  ;;  %423 = vmatprep.subr.mxu1 %v494_v1  ;;  %v219_v45 = vld [vmem:[%s714_s5] sm:$0xff] }
  0x14   :  { %399 = vmatpush3.msra.mxu0 %v37_v11  ;;  %424 = vmatpush3.msra.mxu1 %v131_v22  ;;  %v337_v46 = vld [vmem:[%s713_s4] ss:$0 sm:$0xff]  ;;  %s496_s4 = smov [#allocation2]  }
  0x15   :  { %400 = vmatprep.subr.mxu0 %v494_v1  ;;  %425 = vmatprep.subr.mxu1 %v494_v1  ;;  %v339_v52 = vld [vmem:[%s715_s6] ss:$0 sm:$0xff]  ;;  %s328_s5 = sshll.u32 %s496_s4, 4  ;;  %s329_s5 = int_to_ptr.vmem [resolvable:$true] %s328_s5 }
  0x16   :  { %401 = vmatpush3.msra.mxu0 %v36_v12  ;;  %426 = vmatpush3.msra.mxu1 %v130_v23  ;;  %s472_s6 = scalar_lea.vmem %s329_s5, 128  ;;  %p477_p1 = scmp.lt.s32.totalorder %s329_s5, %s329_s5 }
  0x17   :  { %402 = vmatprep.subr.mxu0 %v494_v1  ;;  %427 = vmatprep.subr.mxu1 %v494_v1  ;;  %p473_p0 = scmp.ne.s32.totalorder %s329_s5, %s472_s6  ;;  %p478_p2 = scmp.lt.s32.totalorder %s472_s6, %s472_s6 }
  0x18   :  { %403 = vmatpush3.msra.mxu0 %v35_v13  ;;  %428 = vmatpush3.msra.mxu1 %v129_v24 }
  0x19   :  { %404 = vmatprep.subr.mxu0 %v494_v1  ;;  %429 = vmatprep.subr.mxu1 %v494_v1  ;;  %p479_p3 = por %p478_p2, %p477_p1 }
  0x1a   :  { %405 = vmatpush3.msra.mxu0 %v34_v14  ;;  %430 = vmatpush3.msra.mxu1 %v128_v25 }
  0x1b   :  { %406 = vmatprep.subr.mxu0 %v494_v1  ;;  %431 = vmatprep.subr.mxu1 %v494_v1  ;;  %p480_p4 = pnand %p479_p3, %p473_p0 }
  0x1c   :  { %407 = vmatpush3.msra.mxu0 %v33_v15  ;;  %432 = vmatpush3.msra.mxu1 %v127_v26 }
  0x1d   :  { %408 = vmatprep.subr.mxu0 %v494_v1  ;;  %433 = vmatprep.subr.mxu1 %v494_v1 }
  0x1e   :  { %409 = vmatpush3.msra.mxu0 %v32_v16  ;;  %434 = vmatpush3.msra.mxu1 %v126_v27 }
  0x1f   :  { %410 = vmatprep.subr.mxu0 %v494_v1  ;;  %438 = vmatprep.subr.mxu1 %v494_v1 }
  0x20   :  { %411 = vmatpush3.msra.mxu0 %v31_v17 }
  0x21   :  { %413 = vmatmul.mubr.f32.vlgmr.msra.gmra.mxu0 %v27_v18 }
  0xe1   :  { %v120_v29 = vpop.f32.mrf.mxu0 }
  0xe2   :  { %v121_v30 = vadd.f32 %v336_v28, %v120_v29 }
  0xe3   :  { %v414_v31 = vpop.f32.mrf.mxu0 }
  0xe4   :  { %464 = vtanh.f32 %v121_v30 }
  0xf1   :  { %v465_v34 = vpop.eup %464 }
  0xf2   :  { %v125_v36 = vsel %vm30_vm1, %v465_v34, %v121_v30 }
  0xf3   :  { %436 = vmatmul.mubr.msk.f32.vlgmr.msra.gmra.mxu1 %vm143_vm2, %v125_v36 }
  0xf4   :  { %439 = vmatpush3.msra.mxu1 %v228_v35  ;;  %458 = vmatprep.mubr.msk.f32.mxu1 %vm495_vm0, %v494_v1 }
  0xf5   :  { %440 = vmatprep.subr.mxu1 %v494_v1 }
  0xf6   :  { %441 = vmatpush3.msra.mxu1 %v227_v37 }
  0xf7   :  { %442 = vmatprep.subr.mxu1 %v494_v1 }
  0xf8   :  { %443 = vmatpush3.msra.mxu1 %v226_v38 }
  0xf9   :  { %444 = vmatprep.subr.mxu1 %v494_v1 }
  0xfa   :  { %445 = vmatpush3.msra.mxu1 %v225_v39 }
  0xfb   :  { %446 = vmatprep.subr.mxu1 %v494_v1 }
  0xfc   :  { %447 = vmatpush3.msra.mxu1 %v224_v40 }
  0xfd   :  { %448 = vmatprep.subr.mxu1 %v494_v1 }
  0xfe   :  { %449 = vmatpush3.msra.mxu1 %v223_v41 }
  0xff   :  { %450 = vmatprep.subr.mxu1 %v494_v1 }
 0x100   :  { %451 = vmatpush3.msra.mxu1 %v222_v42 }
 0x101   :  { %452 = vmatprep.subr.mxu1 %v494_v1 }
 0x102   :  { %453 = vmatpush3.msra.mxu1 %v221_v43 }
 0x103   :  { %454 = vmatprep.subr.mxu1 %v494_v1 }
 0x104   :  { %455 = vmatpush3.msra.mxu1 %v220_v44 }
 0x105   :  { %456 = vmatprep.subr.mxu1 %v494_v1 }
 0x106   :  { %457 = vmatpush3.msra.mxu1 %v219_v45 }
 0x1b3   :  { %v213_v47 = vpop.f32.mrf.mxu1 }
 0x1b4   :  { %v214_v48 = vadd.f32 %v337_v46, %v213_v47 }
 0x1b5   :  { %v437_v49 = vpop.f32.mrf.mxu1 }
 0x1b6   :  { %466 = vtanh.f32 %v214_v48 }
 0x1c3   :  { %v467_v50 = vpop.eup %466 }
 0x1c4   :  { %v218_v51 = vsel %vm30_vm1, %v467_v50, %v214_v48 }
 0x1c5   :  { %459 = vmatmul.mubr.msk.f32.vlgmr.msra.gmra.mxu1 %vm143_vm2, %v218_v51 }
 0x285   :  { %v305_v53 = vpop.f32.mrf.mxu1 }
 0x286   :  { %v306_v54 = vadd.f32 %v339_v52, %v305_v53 }
 0x287   :  { %v460_v55 = vpop.f32.mrf.mxu1 }
 0x288   :  { %v310_v56 = vsel %vm309_vm3, %v306_v54, -inf }
 0x289   :  { %311 = vmax.xlane.f32.xlu0 %v310_v56 }
 0x312   :  { %v312_v57 = vpop.xlane.xlu0 %311 }
 0x313   :  { %v313_v58 = vsub.f32 %v306_v54, %v312_v57 }
 0x315   :  { %v314_v59 = vmul.f32 1.442695, %v313_v58 }
 0x317   :  { %468 = vpow2.f32 %v314_v59 }
 0x324   :  { %v469_v60 = vpop.eup %468 }
 0x325   :  { %v316_v61 = vsel %vm309_vm3, %v469_v60, 0.0 }
 0x326   :  { %317 = vadd.xlane.f32.xlu0 %v316_v61 }
 0x3af   :  { %v318_v62 = vpop.xlane.xlu0 %317 }
 0x3b0   :  { %470 = vrcp.f32 %v318_v62 }
 0x3bd   :  { %v471_v63 = vpop.eup %470 }
 0x3be   :  { %v320_v0 = vmul.f32 %v471_v63, %v469_v60 }
 0x3c0   :  { %321 = vst.msk [vmem:[#allocation2] sm:$0xff] %vm309_vm3, %v320_v0 }
 0x3c1   :  { %483 = shalt.err (!%p480_p4)
}
 0x3c2   :  { %331 = dma.vmem_to_hbm [thread:$0]  %s329_s5, 128, %s716_s7, [#allocation3]  }
 0x3c3   :  { %492 = dma.done.wait [#allocation3], 128  }
 0x3c4   :  { %493 = vsyncadd [#allocation3], 4294967168 }
 0x3c5   :  { %335 = vsyncpa [#allocation3], 1 }

</bundles_post_ra>
